<compile_context>
chip_gen: v5e
topology: v5e:2x2
jax: 0.10.0
libtpu: 0.0.40
codegen_flags: <defaults>
</compile_context>

<pallas_src>
import functools

import numpy as np
import jax
import jax.numpy as jnp
from jax.experimental import pallas as pl
from jax.experimental.pallas import tpu as pltpu


def transformer_block_kernel(x_ref, wqkv_ref, wo_ref, w1_ref, bf1_ref, w2_ref,
                             vecs_ref, o_ref, *, num_heads, mask):
    # vecs_ref rows: 0=bo, 1=norm1 gamma, 2=norm1 beta, 3=norm2 gamma, 4=norm2 beta, 5=ff bias2
    Bb, T, K = x_ref.shape
    H = num_heads
    s = K // H
    scale = 1.0 / np.sqrt(float(s))
    M = Bb * T

    vecs = vecs_ref[...]                                   # (6, K) f32, one load
    bo, g1, b1, g2, b2, bf2 = (vecs[i:i + 1, :] for i in range(6))

    x = x_ref[...].reshape(M, K)                           # (M, K) f32, rows = Bb * T
    x_bf = x.astype(jnp.bfloat16)

    # ---- fused Q/K/V projection: one MXU pass with N = 3K ----
    qkv = jnp.dot(x_bf, wqkv_ref[...],
                  preferred_element_type=jnp.float32)      # (M, 3K) f32 accumulation

    # Fold the softmax scale into Q while still in f32 (cheaper than scaling the scores).
    q_part = qkv[:, :K] * scale
    k_part = qkv[:, K:2 * K]
    v_part = qkv[:, 2 * K:]

    # Fold heads into a leading batch axis: (H*Bb, T, s), head-major.
    # (lane slices + leading-dim reshapes + leading-axis concat only; no lane transposes)
    def split_heads(blk):
        parts = [blk[:, h * s:(h + 1) * s].reshape(Bb, T, s) for h in range(H)]
        return jnp.concatenate(parts, axis=0).astype(jnp.bfloat16)   # (H*Bb, T, s)

    qh, kh, vh = split_heads(q_part), split_heads(k_part), split_heads(v_part)

    # ---- batched attention over all (head, batch) pairs ----
    sc = jnp.einsum("nqd,nkd->nqk", qh, kh,
                    preferred_element_type=jnp.float32)    # (H*Bb, T, T) f32
    if mask:
        # causal mask built once, broadcast over every (head, batch) slice
        row = jax.lax.broadcasted_iota(jnp.int32, (T, T), 0)
        col = jax.lax.broadcasted_iota(jnp.int32, (T, T), 1)
        sc = jnp.where(col > row, -1e30, sc)

    # softmax in f32 (VPU + EUP); reciprocal goes to the EUP slot
    sc = sc - jnp.max(sc, axis=-1, keepdims=True)
    p = jnp.exp(sc)
    p = p * pl.reciprocal(jnp.sum(p, axis=-1, keepdims=True), approx=True)

    ctx = jnp.einsum("nqk,nkd->nqd", p.astype(jnp.bfloat16), vh,
                     preferred_element_type=jnp.float32)   # (H*Bb, T, s)

    # merge heads back into the lane dimension: (H*Bb, T, s) -> (M, K)
    ctx2d = jnp.concatenate(
        [ctx[h * Bb:(h + 1) * Bb].reshape(M, s) for h in range(H)], axis=-1)

    attn = jnp.dot(ctx2d.astype(jnp.bfloat16), wo_ref[...],
                   preferred_element_type=jnp.float32) + bo           # (M, K)

    def layernorm(y, g, b):
        mu = jnp.mean(y, axis=-1, keepdims=True)
        var = jnp.mean(jnp.square(y - mu), axis=-1, keepdims=True)
        return (y - mu) * jax.lax.rsqrt(var + 1e-5) * g + b

    # ---- residual + norm1 (dropout p=0 -> identity) ----
    y = layernorm(attn + x, g1, b1)

    # ---- feed-forward: Linear -> ReLU -> Linear (bf16 operands, f32 accumulation) ----
    h1 = jnp.dot(y.astype(jnp.bfloat16), w1_ref[...],
                 preferred_element_type=jnp.float32) + bf1_ref[...]
    h1 = jnp.maximum(h1, 0.0)
    ff = jnp.dot(h1.astype(jnp.bfloat16), w2_ref[...],
                 preferred_element_type=jnp.float32) + bf2

    # ---- residual + norm2 (dropout p=0 -> identity) ----
    out = layernorm(ff + y, g2, b2)
    o_ref[...] = out.reshape(Bb, T, K).astype(o_ref.dtype)


def _pick_batch_block(B, T, target_rows=256):
    """Smallest divisor of B giving >= target_rows rows per step (else the largest, i.e. B)."""
    best = 1
    for d in range(1, B + 1):
        if B % d == 0:
            best = d
            if d * T >= target_rows:
                break
    return best


def transformer_block(x, params, *, num_heads, mask):
    B, T, K = x.shape
    Hff = params["w1"].shape[1]
    Bb = _pick_batch_block(B, T)

    # bf16 matmul operands (MXU-native); biases / LayerNorm params stay f32.
    wqkv = jnp.concatenate([params["wq"], params["wk"], params["wv"]],
                           axis=1).astype(jnp.bfloat16)                # (K, 3K)
    wo = params["wo"].astype(jnp.bfloat16)
    w1 = params["w1"].astype(jnp.bfloat16)
    w2 = params["w2"].astype(jnp.bfloat16)
    # Pack all (1, K) bias / LayerNorm vectors into one operand -> fewer tiny DMA channels.
    vecs = jnp.concatenate([params["bo"], params["g1"], params["b1"],
                            params["g2"], params["b2"], params["bf2"]], axis=0)  # (6, K)

    def full(shape):
        return pl.BlockSpec(shape, lambda b, _n=len(shape): (0,) * _n)

    # TODO(synk): for K < 128 in real configs, pad the embedding to 128 lanes (lane-dense
    # loads/stores) and flash-tile the (T, T) scores for long sequences on v7x (64 MiB VMEM).
    kernel = functools.partial(transformer_block_kernel,
                               num_heads=num_heads, mask=mask)
    return pl.pallas_call(
        kernel,
        out_shape=jax.ShapeDtypeStruct((B, T, K), jnp.float32),
        grid=(B // Bb,),
        in_specs=[
            pl.BlockSpec((Bb, T, K), lambda b: (b, 0, 0)),   # x: Bb sequences per grid step
            full((K, 3 * K)),                                # fused wq|wk|wv (bf16)
            full((K, K)),                                    # wo (bf16)
            full((K, Hff)), full((1, Hff)),                  # ff linear1 W (bf16), bias
            full((Hff, K)),                                  # ff linear2 W (bf16)
            full((6, K)),                                    # packed bo/g1/b1/g2/b2/bf2
        ],
        out_specs=pl.BlockSpec((Bb, T, K), lambda b: (b, 0, 0)),
        compiler_params=pltpu.CompilerParams(
            dimension_semantics=("parallel",),
            vmem_limit_bytes=48 * 1024 * 1024,               # headroom below v7x's 64 MiB
        ),
    )(x, wqkv, wo, w1, params["bf1"], w2, vecs)


def reference(x, p, *, num_heads, mask):
    """Pure-JAX f32 reference mirroring the PyTorch forward pass."""
    B, T, K = x.shape
    s = K // num_heads
    q = (x @ p["wq"]).reshape(B, T, num_heads, s).transpose(0, 2, 1, 3)
    k = (x @ p["wk"]).reshape(B, T, num_heads, s).transpose(0, 2, 1, 3)
    v = (x @ p["wv"]).reshape(B, T, num_heads, s).transpose(0, 2, 1, 3)
    sc = jnp.einsum("bhqd,bhkd->bhqk", q, k) / np.sqrt(float(s))
    if mask:
        row = jnp.arange(T)[:, None]
        col = jnp.arange(T)[None, :]
        sc = jnp.where(col > row, -jnp.inf, sc)
    a = jax.nn.softmax(sc, axis=-1)
    o = jnp.einsum("bhqk,bhkd->bhqd", a, v).transpose(0, 2, 1, 3).reshape(B, T, K)
    attn = o @ p["wo"] + p["bo"]

    def ln(y, g, b):
        mu = y.mean(-1, keepdims=True)
        var = ((y - mu) ** 2).mean(-1, keepdims=True)
        return (y - mu) / jnp.sqrt(var + 1e-5) * g + b

    y = ln(attn + x, p["g1"], p["b1"])
    h1 = jax.nn.relu(y @ p["w1"] + p["bf1"])
    ff = h1 @ p["w2"] + p["bf2"]
    return ln(ff + y, p["g2"], p["b2"])


def init_params(key, K, H):
    ks = jax.random.split(key, 10)
    sK = 1.0 / np.sqrt(K)
    sH = 1.0 / np.sqrt(H)
    return {
        "wq": jax.random.normal(ks[0], (K, K), jnp.float32) * sK,
        "wk": jax.random.normal(ks[1], (K, K), jnp.float32) * sK,
        "wv": jax.random.normal(ks[2], (K, K), jnp.float32) * sK,
        "wo": jax.random.normal(ks[3], (K, K), jnp.float32) * sK,
        "bo": jax.random.normal(ks[4], (1, K), jnp.float32) * 0.02,
        "g1": 1.0 + 0.1 * jax.random.normal(ks[5], (1, K), jnp.float32),
        "b1": 0.1 * jax.random.normal(ks[6], (1, K), jnp.float32),
        "w1": jax.random.normal(ks[7], (K, H), jnp.float32) * sK,
        "bf1": jnp.zeros((1, H), jnp.float32),
        "w2": jax.random.normal(ks[8], (H, K), jnp.float32) * sH,
        "bf2": jnp.zeros((1, K), jnp.float32),
        "g2": 1.0 + 0.1 * jax.random.normal(ks[9], (1, K), jnp.float32),
        "b2": jnp.zeros((1, K), jnp.float32),
    }


if __name__ == "__main__":
    B, T, K = 2, 8, 32            # batch, seq_length, embedding_dim
    NUM_HEADS = 4
    FF_MULT = 4

    key = jax.random.PRNGKey(0)
    kx, kp = jax.random.split(key)
    x = jax.random.normal(kx, (B, T, K), jnp.float32)
    params = init_params(kp, K, FF_MULT * K)

    # check both the unmasked and the causal-masked paths against the f32 reference
    for MASK in (False, True):
        out = transformer_block(x, params, num_heads=NUM_HEADS, mask=MASK)
        out = jax.block_until_ready(out)
        ref = reference(x, params, num_heads=NUM_HEADS, mask=MASK)
        # tolerance accounts for bf16 matmul operands (f32 accumulation) vs f32 reference
        np.testing.assert_allclose(np.asarray(out), np.asarray(ref), atol=5e-2, rtol=5e-2)

    print("KERNEL_OK")
</pallas_src>

<mosaic_0001>
module attributes {stable_mosaic.version = 11 : i64} {
  func.func @transformer_block_kernel(%arg0: i32, %arg1: memref<2x8x32xf32, #tpu.memory_space<vmem>>, %arg2: memref<32x96xbf16, #tpu.memory_space<vmem>>, %arg3: memref<32x32xbf16, #tpu.memory_space<vmem>>, %arg4: memref<32x128xbf16, #tpu.memory_space<vmem>>, %arg5: memref<1x128xf32, #tpu.memory_space<vmem>>, %arg6: memref<128x32xbf16, #tpu.memory_space<vmem>>, %arg7: memref<6x32xf32, #tpu.memory_space<vmem>>, %arg8: memref<2x8x32xf32, #tpu.memory_space<vmem>>) attributes {dimension_semantics = [#tpu.dimension_semantics<parallel>], iteration_bounds = array<i64: 1>, scalar_prefetch = 0 : i64, scratch_operands = 0 : i64, tpu.core_type = #tpu.core_type<tc>, window_params = [{transform_indices = @transform_0, window_bounds = array<i64: 2, 8, 32>}, {pipeline_mode = #tpu.pipeline_mode<synchronous>, transform_indices = @transform_1, window_bounds = array<i64: 32, 96>}, {pipeline_mode = #tpu.pipeline_mode<synchronous>, transform_indices = @transform_2, window_bounds = array<i64: 32, 32>}, {pipeline_mode = #tpu.pipeline_mode<synchronous>, transform_indices = @transform_3, window_bounds = array<i64: 32, 128>}, {pipeline_mode = #tpu.pipeline_mode<synchronous>, transform_indices = @transform_4, window_bounds = array<i64: 1, 128>}, {pipeline_mode = #tpu.pipeline_mode<synchronous>, transform_indices = @transform_5, window_bounds = array<i64: 128, 32>}, {pipeline_mode = #tpu.pipeline_mode<synchronous>, transform_indices = @transform_6, window_bounds = array<i64: 6, 32>}, {transform_indices = @transform_7, window_bounds = array<i64: 2, 8, 32>}]} {
    %c0 = arith.constant 0 : index
    %c0_0 = arith.constant 0 : index
    %0 = vector.load %arg7[%c0, %c0_0] : memref<6x32xf32, #tpu.memory_space<vmem>>, vector<6x32xf32>
    %1 = vector.extract_strided_slice %0 {offsets = [0, 0], sizes = [1, 32], strides = [1, 1]} : vector<6x32xf32> to vector<1x32xf32>
    %2 = vector.extract_strided_slice %0 {offsets = [1, 0], sizes = [1, 32], strides = [1, 1]} : vector<6x32xf32> to vector<1x32xf32>
    %3 = vector.extract_strided_slice %0 {offsets = [2, 0], sizes = [1, 32], strides = [1, 1]} : vector<6x32xf32> to vector<1x32xf32>
    %4 = vector.extract_strided_slice %0 {offsets = [3, 0], sizes = [1, 32], strides = [1, 1]} : vector<6x32xf32> to vector<1x32xf32>
    %5 = vector.extract_strided_slice %0 {offsets = [4, 0], sizes = [1, 32], strides = [1, 1]} : vector<6x32xf32> to vector<1x32xf32>
    %6 = vector.extract_strided_slice %0 {offsets = [5, 0], sizes = [1, 32], strides = [1, 1]} : vector<6x32xf32> to vector<1x32xf32>
    %c0_1 = arith.constant 0 : index
    %c0_2 = arith.constant 0 : index
    %c0_3 = arith.constant 0 : index
    %7 = vector.load %arg1[%c0_1, %c0_2, %c0_3] : memref<2x8x32xf32, #tpu.memory_space<vmem>>, vector<2x8x32xf32>
    %8 = vector.shape_cast %7 : vector<2x8x32xf32> to vector<16x32xf32>
    %9 = arith.truncf %8 : vector<16x32xf32> to vector<16x32xbf16>
    %c0_4 = arith.constant 0 : index
    %c0_5 = arith.constant 0 : index
    %10 = vector.load %arg2[%c0_4, %c0_5] : memref<32x96xbf16, #tpu.memory_space<vmem>>, vector<32x96xbf16>
    %cst = arith.constant dense<0.000000e+00> : vector<16x96xf32>
    %11 = tpu.matmul %9, %10, %cst {dimension_numbers = #tpu.dot_dimension_numbers<[1], [0], [0], [1], [0, 0, 1, 1], [], []>} : vector<16x32xbf16>, vector<32x96xbf16>, vector<16x96xf32> -> vector<16x96xf32>
    %12 = vector.extract_strided_slice %11 {offsets = [0, 0], sizes = [16, 32], strides = [1, 1]} : vector<16x96xf32> to vector<16x32xf32>
    %cst_6 = arith.constant 0.353553385 : f32
    %13 = vector.broadcast %cst_6 : f32 to vector<16x32xf32>
    %14 = arith.mulf %12, %13 : vector<16x32xf32>
    %15 = vector.extract_strided_slice %11 {offsets = [0, 32], sizes = [16, 32], strides = [1, 1]} : vector<16x96xf32> to vector<16x32xf32>
    %16 = vector.extract_strided_slice %11 {offsets = [0, 64], sizes = [16, 32], strides = [1, 1]} : vector<16x96xf32> to vector<16x32xf32>
    %17 = vector.extract_strided_slice %14 {offsets = [0, 0], sizes = [16, 8], strides = [1, 1]} : vector<16x32xf32> to vector<16x8xf32>
    %18 = vector.shape_cast %17 : vector<16x8xf32> to vector<2x8x8xf32>
    %19 = vector.extract_strided_slice %14 {offsets = [0, 8], sizes = [16, 8], strides = [1, 1]} : vector<16x32xf32> to vector<16x8xf32>
    %20 = vector.shape_cast %19 : vector<16x8xf32> to vector<2x8x8xf32>
    %21 = vector.extract_strided_slice %14 {offsets = [0, 16], sizes = [16, 8], strides = [1, 1]} : vector<16x32xf32> to vector<16x8xf32>
    %22 = vector.shape_cast %21 : vector<16x8xf32> to vector<2x8x8xf32>
    %23 = vector.extract_strided_slice %14 {offsets = [0, 24], sizes = [16, 8], strides = [1, 1]} : vector<16x32xf32> to vector<16x8xf32>
    %24 = vector.shape_cast %23 : vector<16x8xf32> to vector<2x8x8xf32>
    %25 = tpu.concatenate %18, %20, %22, %24 in 0 : vector<2x8x8xf32>, vector<2x8x8xf32>, vector<2x8x8xf32>, vector<2x8x8xf32> -> vector<8x8x8xf32>
    %26 = arith.truncf %25 : vector<8x8x8xf32> to vector<8x8x8xbf16>
    %27 = vector.extract_strided_slice %15 {offsets = [0, 0], sizes = [16, 8], strides = [1, 1]} : vector<16x32xf32> to vector<16x8xf32>
    %28 = vector.shape_cast %27 : vector<16x8xf32> to vector<2x8x8xf32>
    %29 = vector.extract_strided_slice %15 {offsets = [0, 8], sizes = [16, 8], strides = [1, 1]} : vector<16x32xf32> to vector<16x8xf32>
    %30 = vector.shape_cast %29 : vector<16x8xf32> to vector<2x8x8xf32>
    %31 = vector.extract_strided_slice %15 {offsets = [0, 16], sizes = [16, 8], strides = [1, 1]} : vector<16x32xf32> to vector<16x8xf32>
    %32 = vector.shape_cast %31 : vector<16x8xf32> to vector<2x8x8xf32>
    %33 = vector.extract_strided_slice %15 {offsets = [0, 24], sizes = [16, 8], strides = [1, 1]} : vector<16x32xf32> to vector<16x8xf32>
    %34 = vector.shape_cast %33 : vector<16x8xf32> to vector<2x8x8xf32>
    %35 = tpu.concatenate %28, %30, %32, %34 in 0 : vector<2x8x8xf32>, vector<2x8x8xf32>, vector<2x8x8xf32>, vector<2x8x8xf32> -> vector<8x8x8xf32>
    %36 = arith.truncf %35 : vector<8x8x8xf32> to vector<8x8x8xbf16>
    %37 = vector.extract_strided_slice %16 {offsets = [0, 0], sizes = [16, 8], strides = [1, 1]} : vector<16x32xf32> to vector<16x8xf32>
    %38 = vector.shape_cast %37 : vector<16x8xf32> to vector<2x8x8xf32>
    %39 = vector.extract_strided_slice %16 {offsets = [0, 8], sizes = [16, 8], strides = [1, 1]} : vector<16x32xf32> to vector<16x8xf32>
    %40 = vector.shape_cast %39 : vector<16x8xf32> to vector<2x8x8xf32>
    %41 = vector.extract_strided_slice %16 {offsets = [0, 16], sizes = [16, 8], strides = [1, 1]} : vector<16x32xf32> to vector<16x8xf32>
    %42 = vector.shape_cast %41 : vector<16x8xf32> to vector<2x8x8xf32>
    %43 = vector.extract_strided_slice %16 {offsets = [0, 24], sizes = [16, 8], strides = [1, 1]} : vector<16x32xf32> to vector<16x8xf32>
    %44 = vector.shape_cast %43 : vector<16x8xf32> to vector<2x8x8xf32>
    %45 = tpu.concatenate %38, %40, %42, %44 in 0 : vector<2x8x8xf32>, vector<2x8x8xf32>, vector<2x8x8xf32>, vector<2x8x8xf32> -> vector<8x8x8xf32>
    %46 = arith.truncf %45 : vector<8x8x8xf32> to vector<8x8x8xbf16>
    "tpu.trace_start"() <{level = 10 : i32, message = "nqd,nkd->nqk"}> : () -> ()
    %cst_7 = arith.constant dense<0.000000e+00> : vector<8x8x8xf32>
    %47 = tpu.matmul %26, %36, %cst_7 {dimension_numbers = #tpu.dot_dimension_numbers<[2], [2], [1], [1], [0, 0, 0, 1, 1, 1], [0], [0]>} : vector<8x8x8xbf16>, vector<8x8x8xbf16>, vector<8x8x8xf32> -> vector<8x8x8xf32>
    "tpu.trace_stop"() : () -> ()
    %cst_8 = arith.constant dense<0xFF800000> : vector<8x8xf32>
    %48 = vector.multi_reduction <maximumf>, %47, %cst_8 [2] : vector<8x8x8xf32> to vector<8x8xf32>
    %49 = vector.shape_cast %48 : vector<8x8xf32> to vector<8x8x1xf32>
    %50 = vector.broadcast %49 : vector<8x8x1xf32> to vector<8x8x8xf32>
    %51 = arith.subf %47, %50 : vector<8x8x8xf32>
    %52 = math.exp %51 : vector<8x8x8xf32>
    %cst_9 = arith.constant dense<0.000000e+00> : vector<8x8xf32>
    %53 = vector.multi_reduction <add>, %52, %cst_9 [2] : vector<8x8x8xf32> to vector<8x8xf32>
    %54 = vector.shape_cast %53 : vector<8x8xf32> to vector<8x8x1xf32>
    %55 = tpu.reciprocal %54 {approx = true} : vector<8x8x1xf32> -> vector<8x8x1xf32>
    %56 = vector.broadcast %55 : vector<8x8x1xf32> to vector<8x8x8xf32>
    %57 = arith.mulf %52, %56 : vector<8x8x8xf32>
    %58 = arith.truncf %57 : vector<8x8x8xf32> to vector<8x8x8xbf16>
    "tpu.trace_start"() <{level = 10 : i32, message = "nqk,nkd->nqd"}> : () -> ()
    %cst_10 = arith.constant dense<0.000000e+00> : vector<8x8x8xf32>
    %59 = tpu.matmul %58, %46, %cst_10 {dimension_numbers = #tpu.dot_dimension_numbers<[2], [1], [1], [2], [0, 0, 0, 1, 1, 2], [0], [0]>} : vector<8x8x8xbf16>, vector<8x8x8xbf16>, vector<8x8x8xf32> -> vector<8x8x8xf32>
    "tpu.trace_stop"() : () -> ()
    %60 = vector.extract_strided_slice %59 {offsets = [0, 0, 0], sizes = [2, 8, 8], strides = [1, 1, 1]} : vector<8x8x8xf32> to vector<2x8x8xf32>
    %61 = vector.shape_cast %60 : vector<2x8x8xf32> to vector<16x8xf32>
    %62 = vector.extract_strided_slice %59 {offsets = [2, 0, 0], sizes = [2, 8, 8], strides = [1, 1, 1]} : vector<8x8x8xf32> to vector<2x8x8xf32>
    %63 = vector.shape_cast %62 : vector<2x8x8xf32> to vector<16x8xf32>
    %64 = vector.extract_strided_slice %59 {offsets = [4, 0, 0], sizes = [2, 8, 8], strides = [1, 1, 1]} : vector<8x8x8xf32> to vector<2x8x8xf32>
    %65 = vector.shape_cast %64 : vector<2x8x8xf32> to vector<16x8xf32>
    %66 = vector.extract_strided_slice %59 {offsets = [6, 0, 0], sizes = [2, 8, 8], strides = [1, 1, 1]} : vector<8x8x8xf32> to vector<2x8x8xf32>
    %67 = vector.shape_cast %66 : vector<2x8x8xf32> to vector<16x8xf32>
    %68 = tpu.concatenate %61, %63, %65, %67 in 1 : vector<16x8xf32>, vector<16x8xf32>, vector<16x8xf32>, vector<16x8xf32> -> vector<16x32xf32>
    %69 = arith.truncf %68 : vector<16x32xf32> to vector<16x32xbf16>
    %c0_11 = arith.constant 0 : index
    %c0_12 = arith.constant 0 : index
    %70 = vector.load %arg3[%c0_11, %c0_12] : memref<32x32xbf16, #tpu.memory_space<vmem>>, vector<32x32xbf16>
    %cst_13 = arith.constant dense<0.000000e+00> : vector<16x32xf32>
    %71 = tpu.matmul %69, %70, %cst_13 {dimension_numbers = #tpu.dot_dimension_numbers<[1], [0], [0], [1], [0, 0, 1, 1], [], []>} : vector<16x32xbf16>, vector<32x32xbf16>, vector<16x32xf32> -> vector<16x32xf32>
    %72 = vector.broadcast %1 : vector<1x32xf32> to vector<16x32xf32>
    %73 = arith.addf %71, %72 : vector<16x32xf32>
    %74 = arith.addf %73, %8 : vector<16x32xf32>
    %cst_14 = arith.constant dense<0.000000e+00> : vector<16xf32>
    %75 = vector.multi_reduction <add>, %74, %cst_14 [1] : vector<16x32xf32> to vector<16xf32>
    %76 = vector.shape_cast %75 : vector<16xf32> to vector<16x1xf32>
    %cst_15 = arith.constant 3.200000e+01 : f32
    %77 = vector.broadcast %cst_15 : f32 to vector<16x1xf32>
    %78 = arith.divf %76, %77 : vector<16x1xf32>
    %79 = vector.broadcast %78 : vector<16x1xf32> to vector<16x32xf32>
    %80 = arith.subf %74, %79 : vector<16x32xf32>
    %81 = arith.mulf %80, %80 : vector<16x32xf32>
    %cst_16 = arith.constant dense<0.000000e+00> : vector<16xf32>
    %82 = vector.multi_reduction <add>, %81, %cst_16 [1] : vector<16x32xf32> to vector<16xf32>
    %83 = vector.shape_cast %82 : vector<16xf32> to vector<16x1xf32>
    %cst_17 = arith.constant 3.200000e+01 : f32
    %84 = vector.broadcast %cst_17 : f32 to vector<16x1xf32>
    %85 = arith.divf %83, %84 : vector<16x1xf32>
    %86 = vector.broadcast %78 : vector<16x1xf32> to vector<16x32xf32>
    %87 = arith.subf %74, %86 : vector<16x32xf32>
    %cst_18 = arith.constant 9.99999974E-6 : f32
    %88 = vector.broadcast %cst_18 : f32 to vector<16x1xf32>
    %89 = arith.addf %85, %88 : vector<16x1xf32>
    %90 = math.rsqrt %89 : vector<16x1xf32>
    %91 = vector.broadcast %90 : vector<16x1xf32> to vector<16x32xf32>
    %92 = arith.mulf %87, %91 : vector<16x32xf32>
    %93 = vector.broadcast %2 : vector<1x32xf32> to vector<16x32xf32>
    %94 = arith.mulf %92, %93 : vector<16x32xf32>
    %95 = vector.broadcast %3 : vector<1x32xf32> to vector<16x32xf32>
    %96 = arith.addf %94, %95 : vector<16x32xf32>
    %97 = arith.truncf %96 : vector<16x32xf32> to vector<16x32xbf16>
    %c0_19 = arith.constant 0 : index
    %c0_20 = arith.constant 0 : index
    %98 = vector.load %arg4[%c0_19, %c0_20] : memref<32x128xbf16, #tpu.memory_space<vmem>>, vector<32x128xbf16>
    %cst_21 = arith.constant dense<0.000000e+00> : vector<16x128xf32>
    %99 = tpu.matmul %97, %98, %cst_21 {dimension_numbers = #tpu.dot_dimension_numbers<[1], [0], [0], [1], [0, 0, 1, 1], [], []>} : vector<16x32xbf16>, vector<32x128xbf16>, vector<16x128xf32> -> vector<16x128xf32>
    %c0_22 = arith.constant 0 : index
    %c0_23 = arith.constant 0 : index
    %100 = vector.load %arg5[%c0_22, %c0_23] : memref<1x128xf32, #tpu.memory_space<vmem>>, vector<1x128xf32>
    %101 = vector.broadcast %100 : vector<1x128xf32> to vector<16x128xf32>
    %102 = arith.addf %99, %101 : vector<16x128xf32>
    %cst_24 = arith.constant 0.000000e+00 : f32
    %103 = vector.broadcast %cst_24 : f32 to vector<16x128xf32>
    %104 = arith.maximumf %102, %103 : vector<16x128xf32>
    %105 = arith.truncf %104 : vector<16x128xf32> to vector<16x128xbf16>
    %c0_25 = arith.constant 0 : index
    %c0_26 = arith.constant 0 : index
    %106 = vector.load %arg6[%c0_25, %c0_26] : memref<128x32xbf16, #tpu.memory_space<vmem>>, vector<128x32xbf16>
    %cst_27 = arith.constant dense<0.000000e+00> : vector<16x32xf32>
    %107 = tpu.matmul %105, %106, %cst_27 {dimension_numbers = #tpu.dot_dimension_numbers<[1], [0], [0], [1], [0, 0, 1, 1], [], []>} : vector<16x128xbf16>, vector<128x32xbf16>, vector<16x32xf32> -> vector<16x32xf32>
    %108 = vector.broadcast %6 : vector<1x32xf32> to vector<16x32xf32>
    %109 = arith.addf %107, %108 : vector<16x32xf32>
    %110 = arith.addf %109, %96 : vector<16x32xf32>
    %cst_28 = arith.constant dense<0.000000e+00> : vector<16xf32>
    %111 = vector.multi_reduction <add>, %110, %cst_28 [1] : vector<16x32xf32> to vector<16xf32>
    %112 = vector.shape_cast %111 : vector<16xf32> to vector<16x1xf32>
    %cst_29 = arith.constant 3.200000e+01 : f32
    %113 = vector.broadcast %cst_29 : f32 to vector<16x1xf32>
    %114 = arith.divf %112, %113 : vector<16x1xf32>
    %115 = vector.broadcast %114 : vector<16x1xf32> to vector<16x32xf32>
    %116 = arith.subf %110, %115 : vector<16x32xf32>
    %117 = arith.mulf %116, %116 : vector<16x32xf32>
    %cst_30 = arith.constant dense<0.000000e+00> : vector<16xf32>
    %118 = vector.multi_reduction <add>, %117, %cst_30 [1] : vector<16x32xf32> to vector<16xf32>
    %119 = vector.shape_cast %118 : vector<16xf32> to vector<16x1xf32>
    %cst_31 = arith.constant 3.200000e+01 : f32
    %120 = vector.broadcast %cst_31 : f32 to vector<16x1xf32>
    %121 = arith.divf %119, %120 : vector<16x1xf32>
    %122 = vector.broadcast %114 : vector<16x1xf32> to vector<16x32xf32>
    %123 = arith.subf %110, %122 : vector<16x32xf32>
    %cst_32 = arith.constant 9.99999974E-6 : f32
    %124 = vector.broadcast %cst_32 : f32 to vector<16x1xf32>
    %125 = arith.addf %121, %124 : vector<16x1xf32>
    %126 = math.rsqrt %125 : vector<16x1xf32>
    %127 = vector.broadcast %126 : vector<16x1xf32> to vector<16x32xf32>
    %128 = arith.mulf %123, %127 : vector<16x32xf32>
    %129 = vector.broadcast %4 : vector<1x32xf32> to vector<16x32xf32>
    %130 = arith.mulf %128, %129 : vector<16x32xf32>
    %131 = vector.broadcast %5 : vector<1x32xf32> to vector<16x32xf32>
    %132 = arith.addf %130, %131 : vector<16x32xf32>
    %133 = vector.shape_cast %132 : vector<16x32xf32> to vector<2x8x32xf32>
    %c0_33 = arith.constant 0 : index
    %c0_34 = arith.constant 0 : index
    %c0_35 = arith.constant 0 : index
    %134 = vector.load %arg8[%c0_33, %c0_34, %c0_35] : memref<2x8x32xf32, #tpu.memory_space<vmem>>, vector<2x8x32xf32>
    tpu.vector_store %arg8[%c0_33, %c0_34, %c0_35], %133 {strides = array<i32>} : memref<2x8x32xf32, #tpu.memory_space<vmem>>, vector<2x8x32xf32>,
    return
  }
  func.func @transform_0(%arg0: i32) -> (i32, i32, i32) {
    %c0_i32 = arith.constant 0 : i32
    %c0_i32_0 = arith.constant 0 : i32
    %c0_i32_1 = arith.constant 0 : i32
    return %arg0, %c0_i32, %c0_i32_0 : i32, i32, i32
  }
  func.func @transform_1(%arg0: i32) -> (i32, i32) {
    %c0_i32 = arith.constant 0 : i32
    %c0_i32_0 = arith.constant 0 : i32
    %c0_i32_1 = arith.constant 0 : i32
    return %c0_i32, %c0_i32_0 : i32, i32
  }
  func.func @transform_2(%arg0: i32) -> (i32, i32) {
    %c0_i32 = arith.constant 0 : i32
    %c0_i32_0 = arith.constant 0 : i32
    %c0_i32_1 = arith.constant 0 : i32
    return %c0_i32, %c0_i32_0 : i32, i32
  }
  func.func @transform_3(%arg0: i32) -> (i32, i32) {
    %c0_i32 = arith.constant 0 : i32
    %c0_i32_0 = arith.constant 0 : i32
    %c0_i32_1 = arith.constant 0 : i32
    return %c0_i32, %c0_i32_0 : i32, i32
  }
  func.func @transform_4(%arg0: i32) -> (i32, i32) {
    %c0_i32 = arith.constant 0 : i32
    %c0_i32_0 = arith.constant 0 : i32
    %c0_i32_1 = arith.constant 0 : i32
    return %c0_i32, %c0_i32_0 : i32, i32
  }
  func.func @transform_5(%arg0: i32) -> (i32, i32) {
    %c0_i32 = arith.constant 0 : i32
    %c0_i32_0 = arith.constant 0 : i32
    %c0_i32_1 = arith.constant 0 : i32
    return %c0_i32, %c0_i32_0 : i32, i32
  }
  func.func @transform_6(%arg0: i32) -> (i32, i32) {
    %c0_i32 = arith.constant 0 : i32
    %c0_i32_0 = arith.constant 0 : i32
    %c0_i32_1 = arith.constant 0 : i32
    return %c0_i32, %c0_i32_0 : i32, i32
  }
  func.func @transform_7(%arg0: i32) -> (i32, i32, i32) {
    %c0_i32 = arith.constant 0 : i32
    %c0_i32_0 = arith.constant 0 : i32
    %c0_i32_1 = arith.constant 0 : i32
    return %arg0, %c0_i32, %c0_i32_0 : i32, i32, i32
  }
}

</mosaic_0001>

<bundles_post_ra>
// kernel: tpu_custom_call.1
= control target key start
LH: loop header
LB: loop body
LE: loop exit
PB: predicated region body
PF: predicated region fallthrough
CT: control target
= control target key end

     0   :  { %s1353_s0 = inlined_call_operand.vmem [shape: f32[2,8,32], index: 0, kind: input, shape index: {}]   ;;  %s1354_s1 = inlined_call_operand.vmem [shape: bf16[32,96], index: 1, kind: input, shape index: {}]   ;;  %s1355_s2 = inlined_call_operand.vmem [shape: bf16[32,32], index: 2, kind: input, shape index: {}]   ;;  %s1356_s3 = inlined_call_operand.vmem [shape: bf16[32,128], index: 3, kind: input, shape index: {}]   ;;  %s1357_s4 = inlined_call_operand.vmem [shape: f32[1,128], index: 4, kind: input, shape index: {}]   ;;  %s1358_s5 = inlined_call_operand.vmem [shape: bf16[128,32], index: 5, kind: input, shape index: {}]   ;;  %s1359_s6 = inlined_call_operand.vmem [shape: f32[6,32], index: 6, kind: input, shape index: {}]   ;;  %s1360_s7 = inlined_call_operand.hbm [shape: f32[2,8,32], index: 7, kind: output, shape index: {}]  }
   0x1   :  { %v976_v0 = vld [vmem:[%s1354_s1 + $0x8] sm:$0xff] }
   0x2   :  { %12 = vsyncpa [#allocation3], 0  ;;  %58 = vmatpush.bf16.msra.mxu0 %v976_v0  ;;  %v975_v1 = vld [vmem:[%s1354_s1] sm:$0xff]  ;;  %v1149_v3 = vld [vmem:[%s1353_s0 + $0x8] sm:$0xff]  ;;  %vm48_vm0 = vcmask 261120   ;;  %s1084_s9 = smov 112  }
   0x3   :  { %v1144_v2 = vld [vmem:[%s1353_s0] sm:$0xff]  ;;  %s1085_s1 = smov 120   ;;  %s1086_s10 = smov 104   ;;  %vm129_vm1 = vcmask 64512   ;;  %vm418_vm2 = vcmask 1043456   ;;  %vm608_vm3 = vcmask 130048  }
   0x4   :  { %v31_v4 = vpack.c.bf16 %v1149_v3, %v1144_v2  ;;  %s1087_s0 = smov 96   ;;  %s1088_s11 = smov 64   ;;  %vm611_vm4 = vcmask 195584  }
   0x5   :  { %s1089_s12 = smov 8   ;;  %s1090_s13 = smov 24  }
   0x6   :  { %59 = vmatpush.bf16.msra.mxu0 %v975_v1  ;;  %s1091_s14 = smov 16   ;;  %s888_s18 = sshll.u32 %s1360_s7, 4  ;;  %s889_s18 = int_to_ptr.hbm [resolvable:$true] %s888_s18 }
   0x9   :  { %908 = vmatmul.msk.bf16.vlgmr.msra.gmra.mxu0 %vm48_vm0, %v31_v4 }
  0x86   :  { %v61_v5 = vpop.f32.mrf.mxu0 }
  0x87   :  { %104 = vrot.lane.b32.xlu2 %v61_v5, %s1084_s9  ;;  %98 = vrot.lane.b32.xlu0 %v61_v5, %s1085_s1  ;;  %v66_v9 = vmul.f32 0.35355338, %v61_v5  ;;  %v116_v11 = vpack.c.bf16 %v61_v5, %v61_v5 }
  0x89   :  { %v125_v12 = vunpack.c.l.b16 %v116_v11  ;;  %v88_v44 = vpack.c.bf16 %v66_v9, %v66_v9 }
  0x8b   :  { %v126_v13 = vpack.c.b16 %v125_v12, %v125_v12 }
  0x8e   :  { %v63_v6 = vpop.f32.mrf.mxu0 }
  0x8f   :  { %112 = vrot.lane.b32.xlu2 %v63_v6, %s1086_s10  ;;  %106 = vrot.lane.b32.xlu1 %v63_v6, %s1084_s9  ;;  %v117_v7 = vpack.c.bf16 %v63_v6, %v63_v6  ;;  %v67_v33 = vmul.f32 0.35355338, %v63_v6 }
  0x90   :  { %100 = vrot.lane.b32.xlu0 %v63_v6, %s1085_s1 }
  0x91   :  { %v150_v8 = vunpack.c.l.b16 %v117_v7  ;;  %v89_v37 = vpack.c.bf16 %v67_v33, %v67_v33 }
  0x93   :  { %v151_v10 = vpack.c.b16 %v150_v8, %v150_v8 }
  0x97   :  { %70 = vrot.lane.b32.xlu2 %v66_v9, %s1085_s1  ;;  %110 = vrot.lane.b32.xlu1 %v61_v5, %s1086_s10 }
  0x98   :  { %152 = vrot.lane.b32.xlu0 %v151_v10, %s1087_s0 }
  0xa0   :  { %127 = vrot.lane.b32.xlu0 %v126_v13, %s1087_s0 }
  0xe1   :  { %v105_v18 = vpop.permute.xlu2 %104 }
  0xe2   :  { %v120_v36 = vpack.c.bf16 %v105_v18, %v105_v18 }
  0xe4   :  { %v222_v40 = vunpack.c.l.b16 %v120_v36 }
  0xe6   :  { %v1183_v43 = vpack.c.b16 %v222_v40, %v222_v40 }
  0xe9   :  { %v113_v30 = vpop.permute.xlu2 %112 }
  0xea   :  { %v123_v34 = vpack.c.bf16 %v113_v30, %v113_v30 }
  0xec   :  { %v294_v38 = vunpack.c.l.b16 %v123_v34 }
  0xee   :  { %v1181_v42 = vpack.c.b16 %v294_v38, %v294_v38 }
  0xf1   :  { %v71_v45 = vpop.permute.xlu2 %70 }
  0xf2   :  { %v90_v53 = vpack.c.bf16 %v71_v45, %v71_v45 }
  0xf9   :  { %v99_v14 = vpop.permute.xlu0 %98 }
  0xfa   :  { %v118_v15 = vpack.c.bf16 %v99_v14, %v99_v14 }
  0xfc   :  { %v174_v16 = vunpack.c.l.b16 %v118_v15 }
  0xfe   :  { %v175_v17 = vpack.c.b16 %v174_v16, %v174_v16 }
 0x100   :  { %176 = vrot.lane.b32.xlu1 %v175_v17, %s1087_s0 }
 0x101   :  { %v107_v19 = vpop.permute.xlu1 %106 }
 0x102   :  { %v121_v20 = vpack.c.bf16 %v107_v19, %v107_v19  ;;  %v101_v21 = vpop.permute.xlu0 %100 }
 0x103   :  { %v119_v22 = vpack.c.bf16 %v101_v21, %v101_v21 }
 0x104   :  { %v246_v23 = vunpack.c.l.b16 %v121_v20 }
 0x105   :  { %v198_v24 = vunpack.c.l.b16 %v119_v22 }
 0x106   :  { %v1164_v25 = vpack.c.b16 %v246_v23, %v246_v23 }
 0x107   :  { %v1166_v26 = vpack.c.b16 %v198_v24, %v198_v24 }
 0x108   :  { %248 = vrot.lane.b32.xlu2 %v1164_v25, %s1087_s0 }
 0x109   :  { %200 = vrot.lane.b32.xlu1 %v1166_v26, %s1087_s0  ;;  %v111_v27 = vpop.permute.xlu1 %110 }
 0x10a   :  { %v122_v28 = vpack.c.bf16 %v111_v27, %v111_v27  ;;  %v153_v29 = vpop.permute.xlu0 %152 }
 0x10b   :  { %v158_v31 = vsel %vm129_vm1, %v153_v29, 0 }
 0x10c   :  { %v270_v32 = vunpack.c.l.b16 %v122_v28  ;;  %167 = vmatpush.bf16.xpose.msra.mxu2 %v158_v31 }
 0x10e   :  { %v1173_v35 = vpack.c.b16 %v270_v32, %v270_v32 }
 0x110   :  { %272 = vrot.lane.b32.xlu0 %v1173_v35, %s1087_s0  ;;  %78 = vrot.lane.b32.xlu2 %v67_v33, %s1084_s9 }
 0x111   :  { %72 = vrot.lane.b32.xlu1 %v67_v33, %s1085_s1 }
 0x112   :  { %v128_v39 = vpop.permute.xlu0 %127 }
 0x113   :  { %910 = vmatmul.msk.bf16.vlgmr.msra.gmra.mxu2 %vm129_vm1, %v89_v37  ;;  %v134_v41 = vsel %vm129_vm1, %v128_v39, 0 }
 0x114   :  { %143 = vmatpush.bf16.xpose.msra.mxu1 %v134_v41 }
 0x118   :  { %82 = vrot.lane.b32.xlu0 %v66_v9, %s1086_s10  ;;  %296 = vrot.lane.b32.xlu2 %v1181_v42, %s1087_s0 }
 0x119   :  { %224 = vrot.lane.b32.xlu1 %v1183_v43, %s1087_s0 }
 0x11b   :  { %909 = vmatmul.msk.bf16.vlgmr.msra.gmra.mxu1 %vm129_vm1, %v88_v44 }
 0x120   :  { %76 = vrot.lane.b32.xlu0 %v66_v9, %s1084_s9  ;;  %456 = vrot.lane.b32.xlu2 %v175_v17, %s1088_s11 }
 0x121   :  { %84 = vrot.lane.b32.xlu1 %v67_v33, %s1086_s10 }
 0x128   :  { %413 = vrot.lane.b32.xlu0 %v126_v13, %s1088_s11 }
 0x129   :  { %435 = vrot.lane.b32.xlu1 %v151_v10, %s1088_s11 }
 0x162   :  { %v249_v46 = vpop.permute.xlu2 %248 }
 0x163   :  { %v254_v47 = vsel %vm129_vm1, %v249_v46, 0 }
 0x164   :  { %263 = vmatpush.bf16.xpose.msrb.mxu2 %v254_v47 }
 0x16a   :  { %v79_v48 = vpop.permute.xlu2 %78 }
 0x16b   :  { %v93_v49 = vpack.c.bf16 %v79_v48, %v79_v48 }
 0x16d   :  { %914 = vmatmul.msk.bf16.vlgmr.msrb.gmra.mxu2 %vm129_vm1, %v93_v49 }
 0x172   :  { %v177_v50 = vpop.permute.xlu1 %176  ;;  %v297_v52 = vpop.permute.xlu2 %296 }
 0x173   :  { %v182_v51 = vsel %vm129_vm1, %v177_v50, 0  ;;  %v302_v56 = vsel %vm129_vm1, %v297_v52, 0 }
 0x174   :  { %191 = vmatpush.bf16.xpose.msra.mxu3 %v182_v51 }
 0x17a   :  { %v457_v57 = vpop.permute.xlu2 %456 }
 0x17b   :  { %v201_v54 = vpop.permute.xlu1 %200  ;;  %911 = vmatmul.msk.bf16.vlgmr.msra.gmra.mxu3 %vm129_vm1, %v90_v53  ;;  %v462_v61 = vsel %vm418_vm2, %v457_v57, 0 }
 0x17c   :  { %v206_v55 = vsel %vm129_vm1, %v201_v54, 0 }
 0x17d   :  { %215 = vmatpush.bf16.xpose.msrb.mxu0 %v206_v55 }
 0x182   :  { %v273_v58 = vpop.permute.xlu0 %272 }
 0x183   :  { %v73_v59 = vpop.permute.xlu1 %72  ;;  %v278_v60 = vsel %vm129_vm1, %v273_v58, 0 }
 0x184   :  { %v91_v62 = vpack.c.bf16 %v73_v59, %v73_v59  ;;  %287 = vmatpush.bf16.xpose.msrb.mxu3 %v278_v60 }
 0x185   :  { %311 = vmatpush.bf16.xpose.msra.mxu0 %v302_v56 }
 0x186   :  { %912 = vmatmul.msk.bf16.vlgmr.msrb.gmra.mxu0 %vm129_vm1, %v91_v62 }
 0x18a   :  { %v83_v63 = vpop.permute.xlu0 %82 }
 0x18b   :  { %v94_v0 = vpack.c.bf16 %v83_v63, %v83_v63  ;;  %v225_v1 = vpop.permute.xlu1 %224 }
 0x18c   :  { %471 = vmatpush.bf16.msra.mxu3 %v462_v61  ;;  %v230_v4 = vsel %vm129_vm1, %v225_v1, 0 }
 0x18d   :  { %239 = vmatpush.bf16.xpose.msrb.mxu1 %v230_v4  ;;  %915 = vmatmul.msk.bf16.vlgmr.msrb.gmra.mxu3 %vm129_vm1, %v94_v0 }
 0x192   :  { %v77_v5 = vpop.permute.xlu0 %76 }
 0x193   :  { %v92_v6 = vpack.c.bf16 %v77_v5, %v77_v5  ;;  %v85_v7 = vpop.permute.xlu1 %84 }
 0x194   :  { %v95_v8 = vpack.c.bf16 %v85_v7, %v85_v7 }
 0x195   :  { %913 = vmatmul.msk.bf16.vlgmr.msrb.gmra.mxu1 %vm129_vm1, %v92_v6 }
 0x196   :  { %v169_v9 = vpop.f32.mrf.mxu2  ;;  %916 = vmatmul.msk.bf16.vlgmr.msra.gmra.mxu0 %vm129_vm1, %v95_v8 }
 0x197   :  { %v320_v10 = vsel %vm129_vm1, %v169_v9, -inf }
 0x198   :  { %v145_v11 = vpop.f32.mrf.mxu1  ;;  %321 = vmax.xlane.f32.xlu2 %v320_v10 }
 0x199   :  { %v317_v12 = vsel %vm129_vm1, %v145_v11, -inf }
 0x19a   :  { %318 = vmax.xlane.f32.xlu1 %v317_v12  ;;  %v414_v13 = vpop.permute.xlu0 %413 }
 0x19b   :  { %v420_v14 = vsel %vm418_vm2, %v414_v13, 0  ;;  %v436_v15 = vpop.permute.xlu1 %435 }
 0x19c   :  { %v441_v16 = vsel %vm418_vm2, %v436_v15, 0  ;;  %429 = vmatpush.bf16.msra.mxu1 %v420_v14 }
 0x19d   :  { %450 = vmatpush.bf16.msra.mxu2 %v441_v16 }
 0x19e   :  { %v171_v17 = vpop.f32.mrf.mxu2 }
 0x1a0   :  { %v147_v18 = vpop.f32.mrf.mxu1 }
 0x1b3   :  { %477 = vrot.lane.b32.xlu1 %v1166_v26, %s1088_s11 }
 0x1f0   :  { %v1215_v19 = vpop.f32.mrf.mxu2 }
 0x1f1   :  { %v332_v49 = vsel %vm129_vm1, %v1215_v19, -inf }
 0x1f8   :  { %v267_v20 = vpop.f32.mrf.mxu2 }
 0x1fe   :  { %v193_v21 = vpop.f32.mrf.mxu3 }
 0x1ff   :  { %v323_v22 = vsel %vm129_vm1, %v193_v21, -inf }
 0x200   :  { %324 = vmax.xlane.f32.xlu0 %v323_v22 }
 0x203   :  { %v217_v23 = vpop.f32.mrf.mxu0 }
 0x204   :  { %v326_v24 = vsel %vm129_vm1, %v217_v23, -inf }
 0x205   :  { %327 = vmax.xlane.f32.xlu2 %v326_v24 }
 0x206   :  { %v195_v27 = vpop.f32.mrf.mxu3 }
 0x20b   :  { %v219_v28 = vpop.f32.mrf.mxu0  ;;  %v322_v29 = vpop.xlane.xlu2 %321 }
 0x20c   :  { %v342_v30 = vsub.f32 %v169_v9, %v322_v29 }
 0x20d   :  { %v319_v31 = vpop.xlane.xlu1 %318 }
 0x20e   :  { %v351_v32 = vmul.f32 1.442695, %v342_v30  ;;  %v341_v33 = vsub.f32 %v145_v11, %v319_v31 }
 0x210   :  { %1016 = vpow2.f32 %v351_v32  ;;  %v349_v26 = vmul.f32 1.442695, %v341_v33  ;;  %v289_v34 = vpop.f32.mrf.mxu3 }
 0x211   :  { %v335_v36 = vsel %vm129_vm1, %v289_v34, -inf }
 0x212   :  { %1018 = vpow2.f32 %v349_v26  ;;  %336 = vmax.xlane.f32.xlu0 %v335_v36  ;;  %v241_v37 = vpop.f32.mrf.mxu1 }
 0x213   :  { %v1220_v38 = vpop.f32.mrf.mxu0  ;;  %v329_v39 = vsel %vm129_vm1, %v241_v37, -inf }
 0x214   :  { %330 = vmax.xlane.f32.xlu1 %v329_v39  ;;  %v338_v52 = vsel %vm129_vm1, %v1220_v38, -inf }
 0x216   :  { %v1017_v40 = vpop.eup %1016 }
 0x217   :  { %v368_v46 = vsel %vm129_vm1, %v1017_v40, 0.0 }
 0x218   :  { %v1019_v41 = vpop.eup %1018  ;;  %v291_v44 = vpop.f32.mrf.mxu3 }
 0x219   :  { %v365_v45 = vsel %vm129_vm1, %v1019_v41, 0.0 }
 0x21a   :  { %366 = vadd.xlane.f32.xlu2 %v365_v45  ;;  %v243_v47 = vpop.f32.mrf.mxu1  ;;  %369 = vadd.xlane.f32.xlu0 %v368_v46 }
 0x21b   :  { %v315_v48 = vpop.f32.mrf.mxu0 }
 0x222   :  { %333 = vmax.xlane.f32.xlu2 %v332_v49 }
 0x225   :  { %v478_v50 = vpop.permute.xlu1 %477 }
 0x226   :  { %v483_v51 = vsel %vm418_vm2, %v478_v50, 0 }
 0x227   :  { %492 = vmatpush.bf16.msrb.mxu0 %v483_v51 }
 0x22a   :  { %339 = vmax.xlane.f32.xlu2 %v338_v52 }
 0x242   :  { %519 = vrot.lane.b32.xlu2 %v1164_v25, %s1088_s11 }
 0x273   :  { %v325_v56 = vpop.xlane.xlu0 %324 }
 0x274   :  { %v343_v0 = vsub.f32 %v193_v21, %v325_v56 }
 0x276   :  { %v353_v5 = vmul.f32 1.442695, %v343_v0 }
 0x278   :  { %v328_v53 = vpop.xlane.xlu2 %327 }
 0x279   :  { %v344_v54 = vsub.f32 %v217_v23, %v328_v53 }
 0x27b   :  { %v355_v55 = vmul.f32 1.442695, %v344_v54 }
 0x27d   :  { %1020 = vpow2.f32 %v355_v55 }
 0x283   :  { %v1021_v57 = vpop.eup %1020 }
 0x284   :  { %v374_v58 = vsel %vm129_vm1, %v1021_v57, 0.0 }
 0x285   :  { %375 = vadd.xlane.f32.xlu0 %v374_v58  ;;  %v337_v59 = vpop.xlane.xlu0 %336 }
 0x286   :  { %v347_v60 = vsub.f32 %v289_v34, %v337_v59 }
 0x287   :  { %v331_v61 = vpop.xlane.xlu1 %330 }
 0x288   :  { %v361_v62 = vmul.f32 1.442695, %v347_v60  ;;  %v345_v63 = vsub.f32 %v241_v37, %v331_v61 }
 0x28a   :  { %1022 = vpow2.f32 %v361_v62  ;;  %v357_v1 = vmul.f32 1.442695, %v345_v63 }
 0x28c   :  { %1024 = vpow2.f32 %v357_v1 }
 0x28d   :  { %v367_v4 = vpop.xlane.xlu2 %366  ;;  %v370_v25 = vpop.xlane.xlu0 %369 }
 0x28e   :  { %1026 = vrcp.f32 %v367_v4 }
 0x28f   :  { %1028 = vrcp.f32 %v370_v25 }
 0x290   :  { %v1233_v6 = vpop.eup %1022  ;;  %1030 = vpow2.f32 %v353_v5 }
 0x291   :  { %v383_v7 = vsel %vm129_vm1, %v1233_v6, 0.0 }
 0x292   :  { %v1237_v8 = vpop.eup %1024  ;;  %384 = vadd.xlane.f32.xlu2 %v383_v7 }
 0x293   :  { %v377_v9 = vsel %vm129_vm1, %v1237_v8, 0.0 }
 0x294   :  { %v1027_v10 = vpop.eup %1026  ;;  %378 = vadd.xlane.f32.xlu1 %v377_v9 }
 0x295   :  { %v1029_v11 = vpop.eup %1028  ;;  %v397_v12 = vmul.f32 %v1027_v10, %v1019_v41  ;;  %v334_v13 = vpop.xlane.xlu2 %333 }
 0x296   :  { %v398_v14 = vmul.f32 %v1029_v11, %v1017_v40  ;;  %v346_v15 = vsub.f32 %v1215_v19, %v334_v13  ;;  %v1031_v17 = vpop.eup %1030 }
 0x297   :  { %v405_v16 = vpack.c.bf16 %v397_v12, %v397_v12  ;;  %v371_v21 = vsel %vm129_vm1, %v1031_v17, 0.0 }
 0x298   :  { %v406_v18 = vpack.c.bf16 %v398_v14, %v398_v14  ;;  %v359_v20 = vmul.f32 1.442695, %v346_v15 }
 0x299   :  { %917 = vmatmul.msk.bf16.vlgmr.msra.gmra.mxu1 %vm129_vm1, %v405_v16 }
 0x29a   :  { %1032 = vpow2.f32 %v359_v20  ;;  %918 = vmatmul.msk.bf16.vlgmr.msra.gmra.mxu2 %vm129_vm1, %v406_v18  ;;  %v977_v18 = vld [vmem:[%s1355_s2] sm:$0xff] }
 0x29c   :  { %372 = vadd.xlane.f32.xlu1 %v371_v21 }
 0x29d   :  { %v340_v22 = vpop.xlane.xlu2 %339 }
 0x29e   :  { %v348_v23 = vsub.f32 %v1220_v38, %v340_v22 }
 0x2a0   :  { %v1033_v24 = vpop.eup %1032  ;;  %v363_v27 = vmul.f32 1.442695, %v348_v23 }
 0x2a1   :  { %v380_v28 = vsel %vm129_vm1, %v1033_v24, 0.0 }
 0x2a2   :  { %1034 = vpow2.f32 %v363_v27  ;;  %381 = vadd.xlane.f32.xlu0 %v380_v28 }
 0x2a5   :  { %v520_v19 = vpop.permute.xlu2 %519 }
 0x2a6   :  { %v525_v29 = vsel %vm418_vm2, %v520_v19, 0 }
 0x2a7   :  { %534 = vmatpush.bf16.msrb.mxu2 %v525_v29 }
 0x2a8   :  { %v1035_v30 = vpop.eup %1034 }
 0x2a9   :  { %v386_v31 = vsel %vm129_vm1, %v1035_v30, 0.0 }
 0x2aa   :  { %387 = vadd.xlane.f32.xlu0 %v386_v31  ;;  %561 = vrot.lane.b32.xlu2 %v1181_v42, %s1088_s11 }
 0x2b5   :  { %540 = vrot.lane.b32.xlu1 %v1173_v35, %s1088_s11 }
 0x2be   :  { %498 = vrot.lane.b32.xlu0 %v1183_v43, %s1088_s11 }
 0x2f8   :  { %v376_v32 = vpop.xlane.xlu0 %375 }
 0x2f9   :  { %1036 = vrcp.f32 %v376_v32 }
 0x2ff   :  { %v1037_v33 = vpop.eup %1036 }
 0x300   :  { %v400_v26 = vmul.f32 %v1037_v33, %v1021_v57 }
 0x302   :  { %v408_v34 = vpack.c.bf16 %v400_v26, %v400_v26 }
 0x304   :  { %920 = vmatmul.msk.bf16.vlgmr.msrb.gmra.mxu0 %vm129_vm1, %v408_v34 }
 0x305   :  { %v385_v36 = vpop.xlane.xlu2 %384 }
 0x307   :  { %v379_v37 = vpop.xlane.xlu1 %378 }
 0x30d   :  { %v562_v38 = vpop.permute.xlu2 %561 }
 0x30e   :  { %v567_v39 = vsel %vm418_vm2, %v562_v38, 0 }
 0x30f   :  { %v373_v40 = vpop.xlane.xlu1 %372  ;;  %576 = vmatpush.bf16.msra.mxu0 %v567_v39 }
 0x310   :  { %1038 = vrcp.f32 %v373_v40 }
 0x315   :  { %v382_v42 = vpop.xlane.xlu0 %381 }
 0x316   :  { %v1039_v35 = vpop.eup %1038  ;;  %1040 = vrcp.f32 %v382_v42  ;;  %v1257_v41 = vpop.f32.mrf.mxu1 }
 0x317   :  { %v399_v43 = vmul.f32 %v1039_v35, %v1031_v17  ;;  %1042 = vrcp.f32 %v385_v36  ;;  %v978_v17 = vld [vmem:[%s1355_s2 + $0x8] sm:$0xff]  ;;  %s1094_s2 = smov 128  }
 0x319   :  { %v407_v44 = vpack.c.bf16 %v399_v43, %v399_v43 }
 0x31b   :  { %919 = vmatmul.msk.bf16.vlgmr.msra.gmra.mxu3 %vm129_vm1, %v407_v44 }
 0x31c   :  { %v1041_v45 = vpop.eup %1040 }
 0x31d   :  { %v402_v46 = vmul.f32 %v1041_v45, %v1033_v24  ;;  %v388_v47 = vpop.xlane.xlu0 %387  ;;  %v1260_v48 = vpop.f32.mrf.mxu2 }
 0x31e   :  { %1044 = vrcp.f32 %v388_v47  ;;  %v433_v49 = vpop.f32.mrf.mxu1  ;;  %v1043_v51 = vpop.eup %1042 }
 0x31f   :  { %v410_v50 = vpack.c.bf16 %v402_v46, %v402_v46  ;;  %v403_v55 = vmul.f32 %v1043_v51, %v1233_v6  ;;  %1046 = vrcp.f32 %v379_v37  ;;  %v1285_v37 = vld [vmem:[%s1359_s6] sm:$0x3f]  ;;  %v1092_v46 = vmov 32.0  }
 0x320   :  { %v619_v38 = vperm.slane %v1285_v37, 0  ;;  %1048 = vrcp.f32 %v1092_v46 }
 0x321   :  { %922 = vmatmul.msk.bf16.vlgmr.msrb.gmra.mxu2 %vm129_vm1, %v410_v50  ;;  %v411_v59 = vpack.c.bf16 %v403_v55, %v403_v55 }
 0x324   :  { %v1045_v52 = vpop.eup %1044 }
 0x325   :  { %v404_v53 = vmul.f32 %v1045_v52, %v1035_v30  ;;  %v454_v54 = vpop.f32.mrf.mxu2  ;;  %v1047_v60 = vpop.eup %1046 }
 0x326   :  { %v401_v61 = vmul.f32 %v1047_v60, %v1237_v8  ;;  %v1049_v47 = vpop.eup %1048 }
 0x327   :  { %v412_v56 = vpack.c.bf16 %v404_v53, %v404_v53  ;;  %v541_v57 = vpop.permute.xlu1 %540  ;;  %vm662_vm5 = vweird.f32 %v1049_v47 }
 0x328   :  { %v546_v58 = vsel %vm418_vm2, %v541_v57, 0  ;;  %v409_v0 = vpack.c.bf16 %v401_v61, %v401_v61  ;;  %v980_v61 = vld [vmem:[%s1356_s3 + $0x8] sm:$0xff] }
 0x329   :  { %924 = vmatmul.msk.bf16.vlgmr.msra.gmra.mxu0 %vm129_vm1, %v412_v56  ;;  %555 = vmatpush.bf16.msrb.mxu3 %v546_v58 }
 0x32a   :  { %738 = vmatpush.bf16.msra.mxu2 %v980_v61 }
 0x32c   :  { %923 = vmatmul.msk.bf16.vlgmr.msrb.gmra.mxu3 %vm129_vm1, %v411_v59 }
 0x330   :  { %v499_v62 = vpop.permute.xlu0 %498 }
 0x331   :  { %v504_v63 = vsel %vm418_vm2, %v499_v62, 0 }
 0x332   :  { %513 = vmatpush.bf16.msrb.mxu1 %v504_v63 }
 0x335   :  { %921 = vmatmul.msk.bf16.vlgmr.msrb.gmra.mxu1 %vm129_vm1, %v409_v0  ;;  %v979_v0 = vld [vmem:[%s1356_s3] sm:$0xff] }
 0x336   :  { %641 = vmatpush.bf16.msra.mxu1 %v978_v17  ;;  %739 = vmatpush.bf16.msra.mxu2 %v979_v0 }
 0x33a   :  { %642 = vmatpush.bf16.msra.mxu1 %v977_v18 }
 0x381   :  { %v494_v1 = vpop.f32.mrf.mxu0 }
 0x389   :  { %v496_v4 = vpop.f32.mrf.mxu0 }
 0x38a   :  { %v988_v4 = vld [vmem:[%s1358_s5 + $0x38] sm:$0xff] }
 0x38b   :  { %814 = vmatpush.bf16.msra.mxu3 %v988_v4 }
 0x39e   :  { %v473_v25 = vpop.f32.mrf.mxu3 }
 0x39f   :  { %v1000_v5 = vpack.i.bf16 %v494_v1, %v473_v25 }
 0x3a1   :  { %1001 = vrot.lane.b32.xlu0 %v1000_v5, %s1089_s12 }
 0x3a4   :  { %v536_v6 = vpop.f32.mrf.mxu2 }
 0x3a6   :  { %v578_v7 = vpop.f32.mrf.mxu0  ;;  %v475_v9 = vpop.f32.mrf.mxu3 }
 0x3ac   :  { %v538_v10 = vpop.f32.mrf.mxu2 }
 0x3ae   :  { %v580_v11 = vpop.f32.mrf.mxu0 }
 0x3af   :  { %v557_v8 = vpop.f32.mrf.mxu3  ;;  %v986_v11 = vld [vmem:[%s1358_s5 + $0x28] sm:$0xff] }
 0x3b0   :  { %v1010_v12 = vpack.i.bf16 %v578_v7, %v557_v8 }
 0x3b2   :  { %v515_v13 = vpop.f32.mrf.mxu1  ;;  %1011 = vrot.lane.b32.xlu2 %v1010_v12, %s1090_s13 }
 0x3b3   :  { %v1005_v14 = vpack.i.bf16 %v536_v6, %v515_v13  ;;  %v987_v6 = vld [vmem:[%s1358_s5 + $0x30] sm:$0xff]  ;;  %v985_v13 = vld [vmem:[%s1358_s5 + $0x20] sm:$0xff] }
 0x3b4   :  { %815 = vmatpush.bf16.msra.mxu3 %v987_v6 }
 0x3b5   :  { %1006 = vrot.lane.b32.xlu1 %v1005_v14, %s1091_s14 }
 0x3b7   :  { %v559_v15 = vpop.f32.mrf.mxu3 }
 0x3b8   :  { %816 = vmatpush.bf16.msra.mxu3 %v986_v11 }
 0x3ba   :  { %v517_v16 = vpop.f32.mrf.mxu1 }
 0x3bc   :  { %817 = vmatpush.bf16.msra.mxu3 %v985_v13 }
 0x40c   :  { %v1012_v23 = vpop.permute.xlu2 %1011 }
 0x40d   :  { %v1014_v19 = vunpack.i.h.bf16 %v1012_v23  ;;  %v1013_v29 = vunpack.i.l.bf16 %v1012_v23  ;;  %v702_v23 = vperm.slane %v1285_v37, 1 }
 0x413   :  { %v1002_v20 = vpop.permute.xlu0 %1001 }
 0x414   :  { %v1004_v21 = vunpack.i.h.bf16 %v1002_v20  ;;  %v1003_v22 = vunpack.i.l.bf16 %v1002_v20 }
 0x416   :  { %v606_v30 = vsel %vm129_vm1, %v1257_v41, %v1003_v22  ;;  %v607_v31 = vsel %vm129_vm1, %v1260_v48, %v1004_v21  ;;  %v658_v48 = vmul.f32 32.0, %v1049_v47 }
 0x418   :  { %v659_v49 = vsub.f32 1.0, %v658_v48 }
 0x41a   :  { %v660_v50 = vmul.f32 %v1049_v47, %v659_v49 }
 0x41c   :  { %v661_v51 = vadd.f32 %v1049_v47, %v660_v50 }
 0x41e   :  { %v1292_v52 = vsel %vm662_vm5, %v1049_v47, %v661_v51  ;;  %v765_v47 = vperm.slane %v1285_v37, 5 }
 0x427   :  { %v1007_v24 = vpop.permute.xlu1 %1006 }
 0x428   :  { %v1009_v27 = vunpack.i.h.bf16 %v1007_v24  ;;  %v1008_v28 = vunpack.i.l.bf16 %v1007_v24 }
 0x42a   :  { %v610_v32 = vsel %vm608_vm3, %v607_v31, %v1009_v27  ;;  %v609_v33 = vsel %vm608_vm3, %v606_v30, %v1008_v28 }
 0x42b   :  { %v613_v26 = vsel %vm611_vm4, %v610_v32, %v1014_v19  ;;  %v612_v34 = vsel %vm611_vm4, %v609_v33, %v1013_v29  ;;  %v705_v19 = vperm.slane %v1285_v37, 2 }
 0x42c   :  { %v614_v36 = vpack.c.bf16 %v613_v26, %v612_v34  ;;  %v984_v34 = vld [vmem:[%s1358_s5 + $0x18] sm:$0xff] }
 0x42d   :  { %818 = vmatpush.bf16.msra.mxu3 %v984_v34 }
 0x42e   :  { %933 = vmatmul.msk.bf16.vlgmr.msra.gmra.mxu1 %vm48_vm0, %v614_v36  ;;  %v983_v36 = vld [vmem:[%s1358_s5 + $0x10] sm:$0xff] }
 0x431   :  { %819 = vmatpush.bf16.msra.mxu3 %v983_v36 }
 0x4ab   :  { %v644_v39 = vpop.f32.mrf.mxu1 }
 0x4ac   :  { %v645_v40 = vadd.f32 %v644_v39, %v619_v38  ;;  %v981_v39 = vld [vmem:[%s1358_s5] sm:$0xff] }
 0x4ae   :  { %v649_v42 = vadd.f32 %v645_v40, %v1144_v2 }
 0x4b0   :  { %v651_v35 = vsel %vm48_vm0, %v649_v42, 0.0 }
 0x4b1   :  { %652 = vadd.xlane.f32.xlu0 %v651_v35 }
 0x4b3   :  { %v646_v41 = vpop.f32.mrf.mxu1 }
 0x4b4   :  { %v647_v43 = vadd.f32 %v646_v41, %v619_v38  ;;  %v982_v38 = vld [vmem:[%s1358_s5 + $0x8] sm:$0xff] }
 0x4b5   :  { %820 = vmatpush.bf16.msra.mxu3 %v982_v38 }
 0x4b6   :  { %v650_v44 = vadd.f32 %v647_v43, %v1149_v3 }
 0x4b8   :  { %v654_v45 = vsel %vm48_vm0, %v650_v44, 0.0 }
 0x4b9   :  { %655 = vadd.xlane.f32.xlu1 %v654_v45  ;;  %821 = vmatpush.bf16.msra.mxu3 %v981_v39 }
 0x524   :  { %v653_v2 = vpop.xlane.xlu0 %652 }
 0x525   :  { %v664_v53 = vmul.f32 %v1292_v52, %v653_v2 }
 0x527   :  { %v666_v54 = vsub.f32 %v649_v42, %v664_v53  ;;  %v1015_v42 = vld [vmem:[%s1357_s4] ss:$0 sm:$0xff]  ;;  %s1093_s4 = smov [#allocation2]  }
 0x528   :  { %s886_s5 = sshll.u32 %s1093_s4, 4  ;;  %s887_s5 = int_to_ptr.vmem [resolvable:$true] %s886_s5 }
 0x529   :  { %v668_v55 = vmul.f32 %v666_v54, %v666_v54 }
 0x52b   :  { %v670_v3 = vsel %vm48_vm0, %v668_v55, 0.0 }
 0x52c   :  { %v656_v56 = vpop.xlane.xlu1 %655  ;;  %671 = vadd.xlane.f32.xlu2 %v670_v3 }
 0x52d   :  { %v665_v57 = vmul.f32 %v1292_v52, %v656_v56 }
 0x52f   :  { %v667_v58 = vsub.f32 %v650_v44, %v665_v57 }
 0x531   :  { %v669_v59 = vmul.f32 %v667_v58, %v667_v58 }
 0x533   :  { %v673_v60 = vsel %vm48_vm0, %v669_v59, 0.0 }
 0x534   :  { %674 = vadd.xlane.f32.xlu0 %v673_v60 }
 0x59f   :  { %v672_v62 = vpop.xlane.xlu2 %671 }
 0x5a0   :  { %v676_v63 = vmul.f32 %v672_v62, %v1292_v52 }
 0x5a2   :  { %v678_v1 = vadd.f32 1e-05, %v676_v63 }
 0x5a4   :  { %1050 = vrsqrt.f32 %v678_v1  ;;  %vm686_vm7 = vweird.f32 %v678_v1 }
 0x5a7   :  { %v675_v25 = vpop.xlane.xlu0 %674 }
 0x5a8   :  { %v677_v5 = vmul.f32 %v675_v25, %v1292_v52 }
 0x5aa   :  { %v1051_v7 = vpop.eup %1050  ;;  %v679_v9 = vadd.f32 1e-05, %v677_v5 }
 0x5ab   :  { %v681_v10 = vmul.f32 %v1051_v7, %v678_v1  ;;  %vm687_vm6 = vweird.f32 %v1051_v7 }
 0x5ac   :  { %1052 = vrsqrt.f32 %v679_v9  ;;  %vm688_vm8 = vmor %vm686_vm7, %vm687_vm6  ;;  %vm696_vm10 = vweird.f32 %v679_v9 }
 0x5ad   :  { %v682_v8 = vmul.f32 %v1051_v7, %v681_v10 }
 0x5af   :  { %v683_v12 = vmul.f32 0.5, %v682_v8 }
 0x5b1   :  { %v684_v14 = vsub.f32 1.5, %v683_v12 }
 0x5b2   :  { %v1053_v15 = vpop.eup %1052 }
 0x5b3   :  { %v685_v16 = vmul.f32 %v1051_v7, %v684_v14  ;;  %v691_v17 = vmul.f32 %v1053_v15, %v679_v9  ;;  %vm697_vm9 = vweird.f32 %v1053_v15 }
 0x5b4   :  { %vm698_vm11 = vmor %vm696_vm10, %vm697_vm9 }
 0x5b5   :  { %v692_v18 = vmul.f32 %v1053_v15, %v691_v17  ;;  %v689_v20 = vsel %vm688_vm8, %v1051_v7, %v685_v16  ;;  %v874_v16 = vperm.slane %v1285_v37, 3 }
 0x5b6   :  { %v700_v24 = vmul.f32 %v689_v20, %v666_v54 }
 0x5b7   :  { %v693_v21 = vmul.f32 0.5, %v692_v18 }
 0x5b8   :  { %v703_v29 = vmul.f32 %v702_v23, %v700_v24 }
 0x5b9   :  { %v694_v22 = vsub.f32 1.5, %v693_v21 }
 0x5ba   :  { %v706_v32 = vadd.f32 %v705_v19, %v703_v29 }
 0x5bb   :  { %v695_v27 = vmul.f32 %v1053_v15, %v694_v22 }
 0x5bd   :  { %v699_v28 = vsel %vm698_vm11, %v1053_v15, %v695_v27 }
 0x5be   :  { %v701_v30 = vmul.f32 %v699_v28, %v667_v58 }
 0x5c0   :  { %v704_v31 = vmul.f32 %v702_v23, %v701_v30 }
 0x5c2   :  { %v707_v33 = vadd.f32 %v705_v19, %v704_v31 }
 0x5c4   :  { %v708_v26 = vpack.c.bf16 %v707_v33, %v706_v32 }
 0x5c6   :  { %942 = vmatmul.msk.bf16.vlgmr.msra.gmra.mxu2 %vm48_vm0, %v708_v26 }
 0x649   :  { %v741_v40 = vpop.f32.mrf.mxu2 }
 0x64a   :  { %v742_v35 = vadd.f32 %v1015_v42, %v741_v40 }
 0x64c   :  { %v746_v44 = vmax.f32 %v742_v35, 0.0 }
 0x651   :  { %v743_v41 = vpop.f32.mrf.mxu2 }
 0x652   :  { %v744_v43 = vadd.f32 %v1015_v42, %v743_v41 }
 0x654   :  { %v747_v45 = vmax.f32 %v744_v43, 0.0 }
 0x656   :  { %v748_v46 = vpack.c.bf16 %v747_v45, %v746_v44 }
 0x658   :  { %822 = vmatmul.bf16.vlgmr.msra.gmra.mxu3 %v748_v46 }
 0x6db   :  { %v823_v48 = vpop.f32.mrf.mxu3 }
 0x6dc   :  { %v824_v49 = vadd.f32 %v823_v48, %v765_v47 }
 0x6de   :  { %v828_v50 = vadd.f32 %v824_v49, %v706_v32 }
 0x6e0   :  { %v830_v51 = vsel %vm48_vm0, %v828_v50, 0.0 }
 0x6e1   :  { %831 = vadd.xlane.f32.xlu1 %v830_v51 }
 0x6e3   :  { %v825_v2 = vpop.f32.mrf.mxu3 }
 0x6e4   :  { %v826_v53 = vadd.f32 %v825_v2, %v765_v47 }
 0x6e6   :  { %v829_v54 = vadd.f32 %v826_v53, %v707_v33 }
 0x6e8   :  { %v833_v55 = vsel %vm48_vm0, %v829_v54, 0.0 }
 0x6e9   :  { %834 = vadd.xlane.f32.xlu2 %v833_v55 }
 0x754   :  { %v832_v3 = vpop.xlane.xlu1 %831 }
 0x755   :  { %v836_v56 = vmul.f32 %v832_v3, %v1292_v52 }
 0x757   :  { %v838_v57 = vsub.f32 %v828_v50, %v836_v56 }
 0x759   :  { %v840_v58 = vmul.f32 %v838_v57, %v838_v57 }
 0x75b   :  { %v842_v59 = vsel %vm48_vm0, %v840_v58, 0.0 }
 0x75c   :  { %v835_v60 = vpop.xlane.xlu2 %834  ;;  %843 = vadd.xlane.f32.xlu0 %v842_v59 }
 0x75d   :  { %v837_v61 = vmul.f32 %v835_v60, %v1292_v52 }
 0x75f   :  { %v839_v62 = vsub.f32 %v829_v54, %v837_v61 }
 0x761   :  { %v841_v63 = vmul.f32 %v839_v62, %v839_v62 }
 0x763   :  { %v845_v0 = vsel %vm48_vm0, %v841_v63, 0.0 }
 0x764   :  { %846 = vadd.xlane.f32.xlu1 %v845_v0 }
 0x7cf   :  { %v844_v1 = vpop.xlane.xlu0 %843 }
 0x7d0   :  { %v848_v4 = vmul.f32 %v844_v1, %v1292_v52 }
 0x7d2   :  { %v850_v25 = vadd.f32 1e-05, %v848_v4 }
 0x7d4   :  { %1054 = vrsqrt.f32 %v850_v25  ;;  %vm858_vm13 = vweird.f32 %v850_v25 }
 0x7d7   :  { %v847_v5 = vpop.xlane.xlu1 %846 }
 0x7d8   :  { %v849_v6 = vmul.f32 %v847_v5, %v1292_v52  ;;  %v877_v52 = vperm.slane %v1285_v37, 4 }
 0x7da   :  { %v1055_v7 = vpop.eup %1054  ;;  %v851_v9 = vadd.f32 1e-05, %v849_v6 }
 0x7db   :  { %v853_v10 = vmul.f32 %v1055_v7, %v850_v25  ;;  %vm859_vm12 = vweird.f32 %v1055_v7 }
 0x7dc   :  { %1056 = vrsqrt.f32 %v851_v9  ;;  %vm860_vm14 = vmor %vm858_vm13, %vm859_vm12  ;;  %vm868_vm1 = vweird.f32 %v851_v9 }
 0x7dd   :  { %v854_v11 = vmul.f32 %v1055_v7, %v853_v10 }
 0x7df   :  { %v855_v8 = vmul.f32 0.5, %v854_v11 }
 0x7e1   :  { %v856_v12 = vsub.f32 1.5, %v855_v8 }
 0x7e2   :  { %v1057_v13 = vpop.eup %1056 }
 0x7e3   :  { %v857_v14 = vmul.f32 %v1055_v7, %v856_v12  ;;  %v863_v15 = vmul.f32 %v1057_v13, %v851_v9  ;;  %vm869_vm15 = vweird.f32 %v1057_v13 }
 0x7e4   :  { %vm870_vm2 = vmor %vm868_vm1, %vm869_vm15 }
 0x7e5   :  { %v861_v17 = vsel %vm860_vm14, %v1055_v7, %v857_v14  ;;  %v864_v18 = vmul.f32 %v1057_v13, %v863_v15 }
 0x7e6   :  { %v872_v20 = vmul.f32 %v861_v17, %v838_v57 }
 0x7e7   :  { %v865_v21 = vmul.f32 0.5, %v864_v18 }
 0x7e8   :  { %v875_v22 = vmul.f32 %v874_v16, %v872_v20 }
 0x7e9   :  { %v866_v23 = vsub.f32 1.5, %v865_v21 }
 0x7ea   :  { %v878_v24 = vadd.f32 %v877_v52, %v875_v22 }
 0x7eb   :  { %v867_v27 = vmul.f32 %v1057_v13, %v866_v23 }
 0x7ec   :  { %880 = vst.msk [vmem:[#allocation2] sm:$0xff] %vm48_vm0, %v878_v24 }
 0x7ed   :  { %v871_v28 = vsel %vm870_vm2, %v1057_v13, %v867_v27 }
 0x7ee   :  { %v873_v19 = vmul.f32 %v871_v28, %v839_v62 }
 0x7f0   :  { %v876_v29 = vmul.f32 %v874_v16, %v873_v19 }
 0x7f2   :  { %v879_v37 = vadd.f32 %v877_v52, %v876_v29 }
 0x7f4   :  { %881 = vst.msk [vmem:[#allocation2 + $0x8] sm:$0xff] %vm48_vm0, %v879_v37 }
 0x7f5   :  { %894 = dma.vmem_to_hbm [thread:$0]  %s887_s5, 256, %s889_s18, [#allocation3], %s1094_s2, %s1094_s2, %s1089_s12  }
 0x7f6   :  { %1082 = dma.done.wait [#allocation3], 256  }
 0x7f7   :  { %1083 = vsyncadd [#allocation3], 4294967040 }
 0x7f8   :  { %899 = vsyncpa [#allocation3], 1 }

</bundles_post_ra>
